<compile_context>
chip_gen: v7x
topology: tpu7x:2x2x1
jax: 0.10.0
libtpu: 0.0.40
codegen_flags: <defaults>
</compile_context>

<pallas_src>
import jax
import jax.numpy as jnp
from jax.experimental import pallas as pl
from jax.experimental.pallas import tpu as pltpu


_LANE_CAP = 2048              # max lane-slab width (multiple of 128)
_PAD_LANE = 1024              # lane width for the rare ragged fallback
_TARGET_BLOCK_BYTES = 4 << 20 # ~4 MiB per block -> ~16 MiB resident double-buffered
_VMEM_LIMIT_BYTES = 40 << 20  # explicit: > v5e 16 MiB default, < v7x 64 MiB physical


def _residual_coeff_kernel(alpha_ref, x_ref, o_ref):
    # alpha_ref: SMEM (1,) float32 scalar; x_ref / o_ref: VMEM (block_rows, lane)
    o_ref[...] = (alpha_ref[0] * x_ref[...].astype(jnp.float32)).astype(o_ref.dtype)


def _pick_lane(n: int) -> int:
    """Largest multiple-of-128 divisor of n, capped at _LANE_CAP (0 if none)."""
    for k in range(_LANE_CAP // 128, 0, -1):
        lane = 128 * k
        if n % lane == 0:
            return lane
    return 0


def _pick_block_rows(rows: int, lane: int, itemsize: int) -> int:
    """Row-block size: ~4 MiB blocks, multiple of 8, >=2 grid steps when possible."""
    cap = max(8, (_TARGET_BLOCK_BYTES // (lane * itemsize)) // 8 * 8)
    if rows > cap:
        return cap
    if rows >= 16:
        # Split mid-sized inputs into at least 2 parallel steps (v7x megacore,
        # read/write DMA overlap). Blocks stay multiples of 8 rows.
        return min(cap, max(8, (rows // 2) // 8 * 8))
    return rows  # tiny input: single block equal to the full slab


def residual_coefficient(x: jax.Array, alpha: jax.Array, *,
                         keep_input_dtype: bool = False) -> jax.Array:
    """out = alpha * x, with alpha a shape-(1,) learnable parameter (init 0).

    keep_input_dtype=False (default) follows torch promotion (f32 scalar * x).
    keep_input_dtype=True computes in f32 but stores in x.dtype (less HBM
    traffic for bf16/fp8 inputs) -- semantics diverge from strict torch.
    """
    assert alpha.shape == (1,)
    alpha = alpha.astype(jnp.float32)
    out_dtype = x.dtype if keep_input_dtype else jnp.promote_types(x.dtype, jnp.float32)

    orig_shape = x.shape
    n = x.size
    if n == 0:
        return jnp.zeros(orig_shape, out_dtype)

    lane = _pick_lane(n)
    if lane:
        # Zero-copy path: contiguous reshape only, no pad, no post-slice.
        rows = n // lane
        x2d = x.reshape(rows, lane)
        padded = False
    else:
        # Ragged fallback (n not a multiple of 128): pad a single slab.
        # TODO(synk): replace pad/slice round trip with a masked tail block.
        lane = _PAD_LANE if n >= _PAD_LANE else 128
        rows = pl.cdiv(n, lane)
        x_flat = jnp.pad(x.reshape(-1), (0, rows * lane - n))
        x2d = x_flat.reshape(rows, lane)
        padded = True

    itemsize = max(jnp.dtype(x.dtype).itemsize, jnp.dtype(out_dtype).itemsize)
    block_rows = _pick_block_rows(rows, lane, itemsize)
    grid = (pl.cdiv(rows, block_rows),)

    out2d = pl.pallas_call(
        _residual_coeff_kernel,
        out_shape=jax.ShapeDtypeStruct((rows, lane), out_dtype),
        grid=grid,
        in_specs=[
            # scalar parameter lives in SMEM, shared across all grid steps
            pl.BlockSpec(memory_space=pltpu.MemorySpace.SMEM),
            # lane-dense row block per grid step
            pl.BlockSpec((block_rows, lane), lambda i: (i, 0)),
        ],
        out_specs=pl.BlockSpec((block_rows, lane), lambda i: (i, 0)),
        compiler_params=pltpu.CompilerParams(
            dimension_semantics=("parallel",),
            vmem_limit_bytes=_VMEM_LIMIT_BYTES,
        ),
        cost_estimate=pl.CostEstimate(
            flops=n,
            transcendentals=0,
            bytes_accessed=n * (jnp.dtype(x.dtype).itemsize
                                + jnp.dtype(out_dtype).itemsize),
        ),
    )(alpha, x2d)

    if padded:
        return out2d.reshape(-1)[:n].reshape(orig_shape)
    return out2d.reshape(orig_shape)


if __name__ == "__main__":
    key = jax.random.PRNGKey(0)
    B, C, H, W = 2, 4, 16, 16
    x = jax.random.normal(key, (B, C, H, W), dtype=jnp.float32)

    # Parameter exactly as the module's __init__: alpha = zeros(1)
    alpha0 = jnp.zeros((1,), dtype=jnp.float32)
    out0 = jax.block_until_ready(residual_coefficient(x, alpha0))
    assert out0.shape == x.shape and out0.dtype == x.dtype
    assert jnp.allclose(out0, alpha0 * x)  # all zeros at init

    # Trained (nonzero) alpha value.
    alpha1 = jnp.array([0.73], dtype=jnp.float32)
    out1 = jax.block_until_ready(residual_coefficient(x, alpha1))
    assert jnp.allclose(out1, alpha1 * x, rtol=1e-6, atol=1e-6)

    # Larger (still small) shape exercises the multi-block / megacore-split path.
    x_big = jax.random.normal(jax.random.PRNGKey(2), (4, 8, 32, 32), dtype=jnp.float32)
    out_big = jax.block_until_ready(residual_coefficient(x_big, alpha1))
    assert jnp.allclose(out_big, alpha1 * x_big, rtol=1e-6, atol=1e-6)

    # Non-lane-divisible shape exercises the ragged fallback path.
    x_odd = jax.random.normal(jax.random.PRNGKey(1), (3, 5, 7, 11), dtype=jnp.float32)
    out_odd = jax.block_until_ready(residual_coefficient(x_odd, alpha1))
    assert out_odd.shape == x_odd.shape
    assert jnp.allclose(out_odd, alpha1 * x_odd, rtol=1e-6, atol=1e-6)

    # bf16 input: default path promotes to f32 (torch semantics);
    # keep_input_dtype=True stores bf16 to halve output HBM traffic.
    x_bf = x.astype(jnp.bfloat16)
    out_bf_promote = jax.block_until_ready(residual_coefficient(x_bf, alpha1))
    assert out_bf_promote.dtype == jnp.float32
    assert jnp.allclose(out_bf_promote, alpha1 * x_bf.astype(jnp.float32),
                        rtol=1e-6, atol=1e-6)
    out_bf_keep = jax.block_until_ready(
        residual_coefficient(x_bf, alpha1, keep_input_dtype=True))
    assert out_bf_keep.dtype == jnp.bfloat16
    assert jnp.allclose(out_bf_keep.astype(jnp.float32),
                        (alpha1 * x_bf.astype(jnp.float32)),
                        rtol=1e-2, atol=1e-2)

    print("KERNEL_OK")
</pallas_src>

<mosaic_0001>
module attributes {stable_mosaic.version = 11 : i64} {
  func.func @_residual_coeff_kernel(%arg0: i32, %arg1: memref<1xf32, #tpu.memory_space<smem>>, %arg2: memref<1x2048xf32, #tpu.memory_space<vmem>>, %arg3: memref<1x2048xf32, #tpu.memory_space<vmem>>) attributes {dimension_semantics = [#tpu.dimension_semantics<parallel>], iteration_bounds = array<i64: 1>, scalar_prefetch = 0 : i64, scratch_operands = 0 : i64, tpu.core_type = #tpu.core_type<tc>, window_params = [{transform_indices = @transform_0, window_bounds = array<i64: 1>}, {transform_indices = @transform_1, window_bounds = array<i64: 1, 2048>}, {transform_indices = @transform_2, window_bounds = array<i64: 1, 2048>}]} {
    %c0 = arith.constant 0 : index
    %0 = memref.load %arg1[%c0] : memref<1xf32, #tpu.memory_space<smem>>
    %c0_0 = arith.constant 0 : index
    %c0_1 = arith.constant 0 : index
    %1 = vector.load %arg2[%c0_0, %c0_1] : memref<1x2048xf32, #tpu.memory_space<vmem>>, vector<1x2048xf32>
    %2 = vector.broadcast %0 : f32 to vector<1x2048xf32>
    %3 = arith.mulf %2, %1 : vector<1x2048xf32>
    %c0_2 = arith.constant 0 : index
    %c0_3 = arith.constant 0 : index
    %4 = vector.load %arg3[%c0_2, %c0_3] : memref<1x2048xf32, #tpu.memory_space<vmem>>, vector<1x2048xf32>
    tpu.vector_store %arg3[%c0_2, %c0_3], %3 {strides = array<i32>} : memref<1x2048xf32, #tpu.memory_space<vmem>>, vector<1x2048xf32>,
    return
  }
  func.func @transform_0(%arg0: i32) -> i32 {
    %c0_i32 = arith.constant 0 : i32
    %c0_i32_0 = arith.constant 0 : i32
    return %c0_i32 : i32
  }
  func.func @transform_1(%arg0: i32) -> (i32, i32) {
    %c0_i32 = arith.constant 0 : i32
    %c0_i32_0 = arith.constant 0 : i32
    return %arg0, %c0_i32 : i32, i32
  }
  func.func @transform_2(%arg0: i32) -> (i32, i32) {
    %c0_i32 = arith.constant 0 : i32
    %c0_i32_0 = arith.constant 0 : i32
    return %arg0, %c0_i32 : i32, i32
  }
}

</mosaic_0001>

<bundles_post_ra>
// kernel: tpu_custom_call.1
= control target key start
LH: loop header
LB: loop body
LE: loop exit
PB: predicated region body
PF: predicated region fallthrough
CT: control target
= control target key end

     0   :  { %8 = vsyncpa [#allocation4], 0  ;;  %s142_s0 = inlined_call_operand.<no memory space> [shape: f32[1], index: 0, kind: input, shape index: {}]   ;;  %s143_s1 = inlined_call_operand.hbm [shape: f32[1,2048], index: 1, kind: input, shape index: {}]   ;;  %s144_s2 = inlined_call_operand.hbm [shape: f32[1,2048], index: 2, kind: output, shape index: {}]  }
   0x1   :  { %9 = vsyncpa [#allocation5], 0  ;;  %s98_s9 = smov [#allocation3]   ;;  %s50_s13 = scalar_lea.hbm %s143_s1, 256 }
   0x2   :  { %s18_s10 = sshll.u32 %s98_s9, 4  ;;  %p51_p0 = scmp.ne.s32.totalorder %s143_s1, %s50_s13  ;;  %s19_s10 = int_to_ptr.vmem [resolvable:$true] %s18_s10 }
   0x3   :  { %p54_p1 = scmp.lt.u32.totalorder %s50_s13, %s143_s1 }
   0x5   :  { %p56_p2 = pnand %p54_p1, %p51_p0 }
   0x7   :  { %59 = shalt.err (!%p56_p2)
}
   0x8   :  { %s60_s18 = scalar_lea.vmem %s19_s10, 256  ;;  %p65_p4 = scmp.lt.s32.totalorder %s19_s10, %s19_s10 }
   0x9   :  { %p61_p3 = scmp.ne.s32.totalorder %s19_s10, %s60_s18  ;;  %p66_p5 = scmp.lt.s32.totalorder %s60_s18, %s60_s18 }
   0xb   :  { %p67_p6 = por %p66_p5, %p65_p4 }
   0xd   :  { %p68_p7 = pnand %p67_p6, %p61_p3 }
   0xf   :  { %71 = shalt.err (!%p68_p7)
}
  0x10   :  { %21 = dma.hbm_to_vmem [thread:$0]  %s143_s1, 256, %s19_s10, [#allocation4]  }
  0x11   :  { %94 = dma.done.wait [#allocation4], 256  }
  0x12   :  { %95 = vsyncadd [#allocation4], 4294967040  ;;  %v28_v0 = vstv %s142_s0  ;;  %s99_s23 = smov [#allocation6]   ;;  %v26_v1 = vld [vmem:[#allocation3] sm:$0xff]  ;;  %v27_v2 = vld [vmem:[#allocation3 + $0x8] sm:$0xff] }
  0x13   :  { %s39_s24 = sshll.u32 %s99_s23, 4  ;;  %v29_v3 = vmul.f32 %v28_v0, %v26_v1  ;;  %v30_v4 = vmul.f32 %v28_v0, %v27_v2  ;;  %s40_s24 = int_to_ptr.vmem [resolvable:$true] %s39_s24 }
  0x14   :  { %s72_s25 = scalar_lea.vmem %s40_s24, 256  ;;  %p77_p9 = scmp.lt.s32.totalorder %s40_s24, %s40_s24 }
  0x15   :  { %31 = vst [vmem:[#allocation6] sm:$0xff] %v29_v3  ;;  %32 = vst [vmem:[#allocation6 + $0x8] sm:$0xff] %v30_v4  ;;  %p73_p8 = scmp.ne.s32.totalorder %s40_s24, %s72_s25  ;;  %p78_p10 = scmp.lt.s32.totalorder %s72_s25, %s72_s25 }
  0x17   :  { %p79_p11 = por %p78_p10, %p77_p9 }
  0x19   :  { %p80_p12 = pnand %p79_p11, %p73_p8 }
  0x1b   :  { %83 = shalt.err (!%p80_p12)
}
  0x1c   :  { %s84_s0 = scalar_lea.hbm %s144_s2, 256 }
  0x1d   :  { %p85_p13 = scmp.ne.s32.totalorder %s144_s2, %s84_s0  ;;  %p88_p0 = scmp.lt.u32.totalorder %s84_s0, %s144_s2 }
  0x1f   :  { %p90_p1 = pnand %p88_p0, %p85_p13 }
  0x21   :  { %93 = shalt.err (!%p90_p1)
}
  0x22   :  { %42 = dma.vmem_to_hbm [thread:$0]  %s40_s24, 256, %s144_s2, [#allocation5]  }
  0x23   :  { %96 = dma.done.wait [#allocation5], 256  }
  0x24   :  { %97 = vsyncadd [#allocation5], 4294967040 }
  0x25   :  { %46 = vsyncpa [#allocation4], 1 }
  0x26   :  { %47 = vsyncpa [#allocation5], 1 }

</bundles_post_ra>
